<compile_context>
chip_gen: v7x
topology: tpu7x:2x2x1
jax: 0.10.0
libtpu: 0.0.40
codegen_flags: <defaults>
</compile_context>

<pallas_src>
import functools

import jax
import jax.numpy as jnp
from jax.experimental import pallas as pl
from jax.experimental.pallas import tpu as pltpu


def bottleneck_kernel(x_ref, w1_ref, w2_ref, w3_ref, b_ref, m_ref, out_ref, *, W):
    """One group of images per grid step. Activations are (channels, L)."""
    P = w1_ref.shape[0]        # planes
    Cout = w3_ref.shape[0]     # planes * 4
    L = x_ref.shape[1]         # images_per_step * H * W (lane axis)

    b1 = b_ref[0:P, :]                       # (P, 1)
    b2 = b_ref[P:2 * P, :]                   # (P, 1)
    b3 = b_ref[2 * P:2 * P + Cout, :]        # (Cout, 1)

    # ---- conv1 (1x1) + bn1 (scale folded into weights) + relu ----
    h1 = jnp.maximum(
        jnp.dot(w1_ref[...].astype(jnp.float32), x_ref[...],
                preferred_element_type=jnp.float32) + b1, 0.0)       # (P, L)

    # ---- conv2 (3x3, pad=1, stride=1): 9 accumulated tap matmuls ----
    # Each tap is a lane rotation of h1 times a precomputed boundary mask
    # (mask also cuts off cross-image wraparound of the roll).
    acc = None
    t = 0
    for oy in (-1, 0, 1):
        for ox in (-1, 0, 1):
            k = (oy + 1) * 3 + (ox + 1)
            w_tap = w2_ref[k].astype(jnp.float32)                    # (P, P)
            if oy == 0 and ox == 0:
                src = h1
            else:
                s = oy * W + ox
                # rolled[:, j] == h1[:, (j + s) mod L]
                rolled = pltpu.roll(h1, shift=(-s) % L, axis=1)
                src = rolled * m_ref[t]                              # (P, L)
                t += 1
            contrib = jnp.dot(w_tap, src, preferred_element_type=jnp.float32)
            acc = contrib if acc is None else acc + contrib
    h2 = jnp.maximum(acc + b2, 0.0)                                  # (P, L)

    # ---- conv3 (1x1) + bn3 ----
    h3 = jnp.dot(w3_ref[...].astype(jnp.float32), h2,
                 preferred_element_type=jnp.float32) + b3            # (Cout, L)

    # ---- residual add (downsample=None) + relu ----
    out_ref[...] = jnp.maximum(h3 + x_ref[...], 0.0).astype(out_ref.dtype)


def fold_bn(gamma, beta, mean, var, eps=1e-5):
    scale = gamma / jnp.sqrt(var + eps)
    bias = beta - mean * scale
    return scale, bias


def bottleneck_pallas(x_nchw, params, *, images_per_step=None):
    """x_nchw: (N, inplanes, H, W) float32. Returns (N, inplanes, H, W)."""
    w1, bn1, w2, bn2, w3, bn3 = params
    s1, b1 = fold_bn(*bn1)
    s2, b2 = fold_bn(*bn2)
    s3, b3 = fold_bn(*bn3)

    N, Cin, H, W = x_nchw.shape
    HW = H * W
    P = w1.shape[1]
    Cout = w3.shape[1]
    assert Cout == Cin, "downsample=None requires inplanes == planes*4"

    # Single grid step processing the whole batch by default (feedback #1);
    # on v7x pass images_per_step=N//2 to split work over both TensorCores.
    if images_per_step is None:
        images_per_step = N
    assert N % images_per_step == 0
    num_steps = N // images_per_step
    L = images_per_step * HW

    # BN-scale-folded, pre-transposed weights, staged as bf16 (tiny tensors;
    # MXU default precision truncates to bf16 anyway).
    w1t = (w1 * s1[None, :]).T.astype(jnp.bfloat16)                  # (P, Cin)
    w2taps = jnp.transpose(w2 * s2[None, None, None, :],
                           (0, 1, 3, 2)).reshape(9, P, P).astype(jnp.bfloat16)
    w3t = (w3 * s3[None, :]).T.astype(jnp.bfloat16)                  # (Cout, P)
    # Single merged bias input (feedback #6): rows [0:P]=b1, [P:2P]=b2, rest=b3.
    bias = jnp.concatenate([b1, b2, b3]).reshape(2 * P + Cout, 1)    # f32

    # Precomputed conv2 boundary masks for the 8 non-center taps (feedback #3),
    # computed per-image position (col % HW) so they also cancel cross-image
    # wraparound of the full-lane roll; pre-broadcast over the P sublanes so
    # the in-kernel op is a single element-wise multiply.
    col = jnp.arange(L, dtype=jnp.int32) % HW
    ypos, xpos = col // W, col % W
    rows = []
    for oy in (-1, 0, 1):
        for ox in (-1, 0, 1):
            if oy == 0 and ox == 0:
                continue
            rows.append(((ypos + oy >= 0) & (ypos + oy < H) &
                         (xpos + ox >= 0) & (xpos + ox < W)))
    masks = jnp.broadcast_to(
        jnp.stack(rows).astype(jnp.float32)[:, None, :], (8, P, L))  # (8,P,L)

    # (N, C, H, W) -> (C, N*H*W): whole batch on the lane axis, f32 kept for
    # an exact-precision residual add.
    x_cl = jnp.transpose(x_nchw, (1, 0, 2, 3)).reshape(Cin, N * HW)

    full = lambda a: pl.BlockSpec(a.shape, lambda n, _nd=None, _a=a: (0,) * a.ndim)
    kernel = functools.partial(bottleneck_kernel, W=W)

    out_cl = pl.pallas_call(
        kernel,
        out_shape=jax.ShapeDtypeStruct((Cout, N * HW), jnp.float32),
        grid_spec=pltpu.PrefetchScalarGridSpec(
            num_scalar_prefetch=0,
            grid=(num_steps,),
            in_specs=[
                pl.BlockSpec((Cin, L), lambda n: (0, n)),
                full(w1t), full(w2taps), full(w3t), full(bias), full(masks),
            ],
            out_specs=pl.BlockSpec((Cout, L), lambda n: (0, n)),
        ),
        # VMEM use is <1 MiB at CIFAR sizes on every generation; if scaled to
        # ImageNet-like shapes, tile the lane axis and set vmem_limit_bytes
        # explicitly (v7x has only 64 MiB physical / 32 MiB default scoped).
        compiler_params=pltpu.CompilerParams(
            dimension_semantics=("parallel",)),
    )(x_cl, w1t, w2taps, w3t, bias, masks)

    return jnp.transpose(out_cl.reshape(Cout, N, H, W), (1, 0, 2, 3))


# ------------------------- pure-JAX reference -------------------------
def bottleneck_reference(x_nchw, params):
    w1, bn1, w2, bn2, w3, bn3 = params
    s1, b1 = fold_bn(*bn1)
    s2, b2 = fold_bn(*bn2)
    s3, b3 = fold_bn(*bn3)
    Cin, P = w1.shape
    Cout = w3.shape[1]

    x = jnp.transpose(x_nchw, (0, 2, 3, 1))                          # NHWC
    dn = ('NHWC', 'HWIO', 'NHWC')

    def conv(h, w_hwio, pad):
        return jax.lax.conv_general_dilated(h, w_hwio, (1, 1), pad,
                                            dimension_numbers=dn)

    h = conv(x, (w1 * s1[None, :]).reshape(1, 1, Cin, P), 'VALID') + b1
    h = jnp.maximum(h, 0.0)
    h = conv(h, w2 * s2[None, None, None, :], [(1, 1), (1, 1)]) + b2
    h = jnp.maximum(h, 0.0)
    h = conv(h, (w3 * s3[None, :]).reshape(1, 1, P, Cout), 'VALID') + b3
    out = jnp.maximum(h + x, 0.0)
    return jnp.transpose(out, (0, 3, 1, 2))


if __name__ == "__main__":
    N, inplanes, H, W = 2, 16, 16, 16
    planes = inplanes // 4        # expansion = 4, downsample=None

    key = jax.random.PRNGKey(0)
    ks = jax.random.split(key, 8)

    x = jax.random.normal(ks[0], (N, inplanes, H, W), jnp.float32)

    # conv weights stored in matmul-friendly layouts:
    #   w1: (Cin, P)   w2: (3, 3, P, P) HWIO   w3: (P, 4P)
    w1 = jax.random.normal(ks[1], (inplanes, planes), jnp.float32) * 0.2
    w2 = jax.random.normal(ks[2], (3, 3, planes, planes), jnp.float32) * 0.2
    w3 = jax.random.normal(ks[3], (planes, planes * 4), jnp.float32) * 0.2

    def bn_params(k, c):
        k1, k2, k3, k4 = jax.random.split(k, 4)
        gamma = 1.0 + 0.1 * jax.random.normal(k1, (c,), jnp.float32)
        beta = 0.1 * jax.random.normal(k2, (c,), jnp.float32)
        mean = 0.1 * jax.random.normal(k3, (c,), jnp.float32)
        var = 0.5 + jnp.abs(jax.random.normal(k4, (c,), jnp.float32))
        return (gamma, beta, mean, var)

    bn1 = bn_params(ks[4], planes)
    bn2 = bn_params(ks[5], planes)
    bn3 = bn_params(ks[6], planes * 4)

    params = (w1, bn1, w2, bn2, w3, bn3)

    out = jax.block_until_ready(bottleneck_pallas(x, params))
    ref = bottleneck_reference(x, params)

    assert out.shape == (N, inplanes, H, W)
    # Tolerance sized for default-precision (bf16 passes, f32 accumulation)
    # MXU matmuls on both the kernel and the reference path.
    max_err = float(jnp.max(jnp.abs(out - ref)))
    assert jnp.allclose(out, ref, rtol=2e-2, atol=2e-2), max_err

    print("KERNEL_OK")
</pallas_src>

<mosaic_0001>
module attributes {stable_mosaic.version = 11 : i64} {
  func.func @bottleneck_kernel(%arg0: i32, %arg1: memref<16x512xf32, #tpu.memory_space<vmem>>, %arg2: memref<4x16xbf16, #tpu.memory_space<vmem>>, %arg3: memref<9x4x4xbf16, #tpu.memory_space<vmem>>, %arg4: memref<16x4xbf16, #tpu.memory_space<vmem>>, %arg5: memref<24x1xf32, #tpu.memory_space<vmem>>, %arg6: memref<8x4x512xf32, #tpu.memory_space<vmem>>, %arg7: memref<16x512xf32, #tpu.memory_space<vmem>>) attributes {dimension_semantics = [#tpu.dimension_semantics<parallel>], iteration_bounds = array<i64: 1>, scalar_prefetch = 0 : i64, scratch_operands = 0 : i64, tpu.core_type = #tpu.core_type<tc>, window_params = [{transform_indices = @transform_0, window_bounds = array<i64: 16, 512>}, {pipeline_mode = #tpu.pipeline_mode<synchronous>, transform_indices = @transform_1, window_bounds = array<i64: 4, 16>}, {pipeline_mode = #tpu.pipeline_mode<synchronous>, transform_indices = @transform_2, window_bounds = array<i64: 9, 4, 4>}, {pipeline_mode = #tpu.pipeline_mode<synchronous>, transform_indices = @transform_3, window_bounds = array<i64: 16, 4>}, {pipeline_mode = #tpu.pipeline_mode<synchronous>, transform_indices = @transform_4, window_bounds = array<i64: 24, 1>}, {pipeline_mode = #tpu.pipeline_mode<synchronous>, transform_indices = @transform_5, window_bounds = array<i64: 8, 4, 512>}, {transform_indices = @transform_6, window_bounds = array<i64: 16, 512>}]} {
    %c0 = arith.constant 0 : index
    %c0_0 = arith.constant 0 : index
    %0 = vector.load %arg5[%c0, %c0_0] : memref<24x1xf32, #tpu.memory_space<vmem>>, vector<4x1xf32>
    %c4 = arith.constant 4 : index
    %c0_1 = arith.constant 0 : index
    %1 = vector.load %arg5[%c4, %c0_1] : memref<24x1xf32, #tpu.memory_space<vmem>>, vector<4x1xf32>
    %c8 = arith.constant 8 : index
    %c0_2 = arith.constant 0 : index
    %2 = vector.load %arg5[%c8, %c0_2] : memref<24x1xf32, #tpu.memory_space<vmem>>, vector<16x1xf32>
    %c0_3 = arith.constant 0 : index
    %c0_4 = arith.constant 0 : index
    %3 = vector.load %arg2[%c0_3, %c0_4] : memref<4x16xbf16, #tpu.memory_space<vmem>>, vector<4x16xbf16>
    %4 = arith.extf %3 : vector<4x16xbf16> to vector<4x16xf32>
    %c0_5 = arith.constant 0 : index
    %c0_6 = arith.constant 0 : index
    %5 = vector.load %arg1[%c0_5, %c0_6] : memref<16x512xf32, #tpu.memory_space<vmem>>, vector<16x512xf32>
    %cst = arith.constant dense<0.000000e+00> : vector<4x512xf32>
    %6 = tpu.matmul %4, %5, %cst {dimension_numbers = #tpu.dot_dimension_numbers<[1], [0], [0], [1], [0, 0, 1, 1], [], []>} : vector<4x16xf32>, vector<16x512xf32>, vector<4x512xf32> -> vector<4x512xf32>
    %7 = vector.broadcast %0 : vector<4x1xf32> to vector<4x512xf32>
    %8 = arith.addf %6, %7 : vector<4x512xf32>
    %cst_7 = arith.constant 0.000000e+00 : f32
    %9 = vector.broadcast %cst_7 : f32 to vector<4x512xf32>
    %10 = arith.maximumf %8, %9 : vector<4x512xf32>
    %c0_8 = arith.constant 0 : index
    %c0_9 = arith.constant 0 : index
    %c0_10 = arith.constant 0 : index
    %11 = vector.load %arg3[%c0_8, %c0_9, %c0_10] : memref<9x4x4xbf16, #tpu.memory_space<vmem>>, vector<1x4x4xbf16>
    %12 = vector.shape_cast %11 : vector<1x4x4xbf16> to vector<4x4xbf16>
    %13 = arith.extf %12 : vector<4x4xbf16> to vector<4x4xf32>
    %c17_i32 = arith.constant 17 : i32
    %14 = tpu.dynamic_rotate %10 by %c17_i32 dim 1 : vector<4x512xf32>, i32 -> vector<4x512xf32>
    %c0_11 = arith.constant 0 : index
    %c0_12 = arith.constant 0 : index
    %c0_13 = arith.constant 0 : index
    %15 = vector.load %arg6[%c0_11, %c0_12, %c0_13] : memref<8x4x512xf32, #tpu.memory_space<vmem>>, vector<1x4x512xf32>
    %16 = vector.shape_cast %15 : vector<1x4x512xf32> to vector<4x512xf32>
    %17 = arith.mulf %14, %16 : vector<4x512xf32>
    %cst_14 = arith.constant dense<0.000000e+00> : vector<4x512xf32>
    %18 = tpu.matmul %13, %17, %cst_14 {dimension_numbers = #tpu.dot_dimension_numbers<[1], [0], [0], [1], [0, 0, 1, 1], [], []>} : vector<4x4xf32>, vector<4x512xf32>, vector<4x512xf32> -> vector<4x512xf32>
    %c1 = arith.constant 1 : index
    %c0_15 = arith.constant 0 : index
    %c0_16 = arith.constant 0 : index
    %19 = vector.load %arg3[%c1, %c0_15, %c0_16] : memref<9x4x4xbf16, #tpu.memory_space<vmem>>, vector<1x4x4xbf16>
    %20 = vector.shape_cast %19 : vector<1x4x4xbf16> to vector<4x4xbf16>
    %21 = arith.extf %20 : vector<4x4xbf16> to vector<4x4xf32>
    %c16_i32 = arith.constant 16 : i32
    %22 = tpu.dynamic_rotate %10 by %c16_i32 dim 1 : vector<4x512xf32>, i32 -> vector<4x512xf32>
    %c1_17 = arith.constant 1 : index
    %c0_18 = arith.constant 0 : index
    %c0_19 = arith.constant 0 : index
    %23 = vector.load %arg6[%c1_17, %c0_18, %c0_19] : memref<8x4x512xf32, #tpu.memory_space<vmem>>, vector<1x4x512xf32>
    %24 = vector.shape_cast %23 : vector<1x4x512xf32> to vector<4x512xf32>
    %25 = arith.mulf %22, %24 : vector<4x512xf32>
    %cst_20 = arith.constant dense<0.000000e+00> : vector<4x512xf32>
    %26 = tpu.matmul %21, %25, %cst_20 {dimension_numbers = #tpu.dot_dimension_numbers<[1], [0], [0], [1], [0, 0, 1, 1], [], []>} : vector<4x4xf32>, vector<4x512xf32>, vector<4x512xf32> -> vector<4x512xf32>
    %27 = arith.addf %18, %26 : vector<4x512xf32>
    %c2 = arith.constant 2 : index
    %c0_21 = arith.constant 0 : index
    %c0_22 = arith.constant 0 : index
    %28 = vector.load %arg3[%c2, %c0_21, %c0_22] : memref<9x4x4xbf16, #tpu.memory_space<vmem>>, vector<1x4x4xbf16>
    %29 = vector.shape_cast %28 : vector<1x4x4xbf16> to vector<4x4xbf16>
    %30 = arith.extf %29 : vector<4x4xbf16> to vector<4x4xf32>
    %c15_i32 = arith.constant 15 : i32
    %31 = tpu.dynamic_rotate %10 by %c15_i32 dim 1 : vector<4x512xf32>, i32 -> vector<4x512xf32>
    %c2_23 = arith.constant 2 : index
    %c0_24 = arith.constant 0 : index
    %c0_25 = arith.constant 0 : index
    %32 = vector.load %arg6[%c2_23, %c0_24, %c0_25] : memref<8x4x512xf32, #tpu.memory_space<vmem>>, vector<1x4x512xf32>
    %33 = vector.shape_cast %32 : vector<1x4x512xf32> to vector<4x512xf32>
    %34 = arith.mulf %31, %33 : vector<4x512xf32>
    %cst_26 = arith.constant dense<0.000000e+00> : vector<4x512xf32>
    %35 = tpu.matmul %30, %34, %cst_26 {dimension_numbers = #tpu.dot_dimension_numbers<[1], [0], [0], [1], [0, 0, 1, 1], [], []>} : vector<4x4xf32>, vector<4x512xf32>, vector<4x512xf32> -> vector<4x512xf32>
    %36 = arith.addf %27, %35 : vector<4x512xf32>
    %c3 = arith.constant 3 : index
    %c0_27 = arith.constant 0 : index
    %c0_28 = arith.constant 0 : index
    %37 = vector.load %arg3[%c3, %c0_27, %c0_28] : memref<9x4x4xbf16, #tpu.memory_space<vmem>>, vector<1x4x4xbf16>
    %38 = vector.shape_cast %37 : vector<1x4x4xbf16> to vector<4x4xbf16>
    %39 = arith.extf %38 : vector<4x4xbf16> to vector<4x4xf32>
    %c1_i32 = arith.constant 1 : i32
    %40 = tpu.dynamic_rotate %10 by %c1_i32 dim 1 : vector<4x512xf32>, i32 -> vector<4x512xf32>
    %c3_29 = arith.constant 3 : index
    %c0_30 = arith.constant 0 : index
    %c0_31 = arith.constant 0 : index
    %41 = vector.load %arg6[%c3_29, %c0_30, %c0_31] : memref<8x4x512xf32, #tpu.memory_space<vmem>>, vector<1x4x512xf32>
    %42 = vector.shape_cast %41 : vector<1x4x512xf32> to vector<4x512xf32>
    %43 = arith.mulf %40, %42 : vector<4x512xf32>
    %cst_32 = arith.constant dense<0.000000e+00> : vector<4x512xf32>
    %44 = tpu.matmul %39, %43, %cst_32 {dimension_numbers = #tpu.dot_dimension_numbers<[1], [0], [0], [1], [0, 0, 1, 1], [], []>} : vector<4x4xf32>, vector<4x512xf32>, vector<4x512xf32> -> vector<4x512xf32>
    %45 = arith.addf %36, %44 : vector<4x512xf32>
    %c4_33 = arith.constant 4 : index
    %c0_34 = arith.constant 0 : index
    %c0_35 = arith.constant 0 : index
    %46 = vector.load %arg3[%c4_33, %c0_34, %c0_35] : memref<9x4x4xbf16, #tpu.memory_space<vmem>>, vector<1x4x4xbf16>
    %47 = vector.shape_cast %46 : vector<1x4x4xbf16> to vector<4x4xbf16>
    %48 = arith.extf %47 : vector<4x4xbf16> to vector<4x4xf32>
    %cst_36 = arith.constant dense<0.000000e+00> : vector<4x512xf32>
    %49 = tpu.matmul %48, %10, %cst_36 {dimension_numbers = #tpu.dot_dimension_numbers<[1], [0], [0], [1], [0, 0, 1, 1], [], []>} : vector<4x4xf32>, vector<4x512xf32>, vector<4x512xf32> -> vector<4x512xf32>
    %50 = arith.addf %45, %49 : vector<4x512xf32>
    %c5 = arith.constant 5 : index
    %c0_37 = arith.constant 0 : index
    %c0_38 = arith.constant 0 : index
    %51 = vector.load %arg3[%c5, %c0_37, %c0_38] : memref<9x4x4xbf16, #tpu.memory_space<vmem>>, vector<1x4x4xbf16>
    %52 = vector.shape_cast %51 : vector<1x4x4xbf16> to vector<4x4xbf16>
    %53 = arith.extf %52 : vector<4x4xbf16> to vector<4x4xf32>
    %c511_i32 = arith.constant 511 : i32
    %54 = tpu.dynamic_rotate %10 by %c511_i32 dim 1 : vector<4x512xf32>, i32 -> vector<4x512xf32>
    %c4_39 = arith.constant 4 : index
    %c0_40 = arith.constant 0 : index
    %c0_41 = arith.constant 0 : index
    %55 = vector.load %arg6[%c4_39, %c0_40, %c0_41] : memref<8x4x512xf32, #tpu.memory_space<vmem>>, vector<1x4x512xf32>
    %56 = vector.shape_cast %55 : vector<1x4x512xf32> to vector<4x512xf32>
    %57 = arith.mulf %54, %56 : vector<4x512xf32>
    %cst_42 = arith.constant dense<0.000000e+00> : vector<4x512xf32>
    %58 = tpu.matmul %53, %57, %cst_42 {dimension_numbers = #tpu.dot_dimension_numbers<[1], [0], [0], [1], [0, 0, 1, 1], [], []>} : vector<4x4xf32>, vector<4x512xf32>, vector<4x512xf32> -> vector<4x512xf32>
    %59 = arith.addf %50, %58 : vector<4x512xf32>
    %c6 = arith.constant 6 : index
    %c0_43 = arith.constant 0 : index
    %c0_44 = arith.constant 0 : index
    %60 = vector.load %arg3[%c6, %c0_43, %c0_44] : memref<9x4x4xbf16, #tpu.memory_space<vmem>>, vector<1x4x4xbf16>
    %61 = vector.shape_cast %60 : vector<1x4x4xbf16> to vector<4x4xbf16>
    %62 = arith.extf %61 : vector<4x4xbf16> to vector<4x4xf32>
    %c497_i32 = arith.constant 497 : i32
    %63 = tpu.dynamic_rotate %10 by %c497_i32 dim 1 : vector<4x512xf32>, i32 -> vector<4x512xf32>
    %c5_45 = arith.constant 5 : index
    %c0_46 = arith.constant 0 : index
    %c0_47 = arith.constant 0 : index
    %64 = vector.load %arg6[%c5_45, %c0_46, %c0_47] : memref<8x4x512xf32, #tpu.memory_space<vmem>>, vector<1x4x512xf32>
    %65 = vector.shape_cast %64 : vector<1x4x512xf32> to vector<4x512xf32>
    %66 = arith.mulf %63, %65 : vector<4x512xf32>
    %cst_48 = arith.constant dense<0.000000e+00> : vector<4x512xf32>
    %67 = tpu.matmul %62, %66, %cst_48 {dimension_numbers = #tpu.dot_dimension_numbers<[1], [0], [0], [1], [0, 0, 1, 1], [], []>} : vector<4x4xf32>, vector<4x512xf32>, vector<4x512xf32> -> vector<4x512xf32>
    %68 = arith.addf %59, %67 : vector<4x512xf32>
    %c7 = arith.constant 7 : index
    %c0_49 = arith.constant 0 : index
    %c0_50 = arith.constant 0 : index
    %69 = vector.load %arg3[%c7, %c0_49, %c0_50] : memref<9x4x4xbf16, #tpu.memory_space<vmem>>, vector<1x4x4xbf16>
    %70 = vector.shape_cast %69 : vector<1x4x4xbf16> to vector<4x4xbf16>
    %71 = arith.extf %70 : vector<4x4xbf16> to vector<4x4xf32>
    %c496_i32 = arith.constant 496 : i32
    %72 = tpu.dynamic_rotate %10 by %c496_i32 dim 1 : vector<4x512xf32>, i32 -> vector<4x512xf32>
    %c6_51 = arith.constant 6 : index
    %c0_52 = arith.constant 0 : index
    %c0_53 = arith.constant 0 : index
    %73 = vector.load %arg6[%c6_51, %c0_52, %c0_53] : memref<8x4x512xf32, #tpu.memory_space<vmem>>, vector<1x4x512xf32>
    %74 = vector.shape_cast %73 : vector<1x4x512xf32> to vector<4x512xf32>
    %75 = arith.mulf %72, %74 : vector<4x512xf32>
    %cst_54 = arith.constant dense<0.000000e+00> : vector<4x512xf32>
    %76 = tpu.matmul %71, %75, %cst_54 {dimension_numbers = #tpu.dot_dimension_numbers<[1], [0], [0], [1], [0, 0, 1, 1], [], []>} : vector<4x4xf32>, vector<4x512xf32>, vector<4x512xf32> -> vector<4x512xf32>
    %77 = arith.addf %68, %76 : vector<4x512xf32>
    %c8_55 = arith.constant 8 : index
    %c0_56 = arith.constant 0 : index
    %c0_57 = arith.constant 0 : index
    %78 = vector.load %arg3[%c8_55, %c0_56, %c0_57] : memref<9x4x4xbf16, #tpu.memory_space<vmem>>, vector<1x4x4xbf16>
    %79 = vector.shape_cast %78 : vector<1x4x4xbf16> to vector<4x4xbf16>
    %80 = arith.extf %79 : vector<4x4xbf16> to vector<4x4xf32>
    %c495_i32 = arith.constant 495 : i32
    %81 = tpu.dynamic_rotate %10 by %c495_i32 dim 1 : vector<4x512xf32>, i32 -> vector<4x512xf32>
    %c7_58 = arith.constant 7 : index
    %c0_59 = arith.constant 0 : index
    %c0_60 = arith.constant 0 : index
    %82 = vector.load %arg6[%c7_58, %c0_59, %c0_60] : memref<8x4x512xf32, #tpu.memory_space<vmem>>, vector<1x4x512xf32>
    %83 = vector.shape_cast %82 : vector<1x4x512xf32> to vector<4x512xf32>
    %84 = arith.mulf %81, %83 : vector<4x512xf32>
    %cst_61 = arith.constant dense<0.000000e+00> : vector<4x512xf32>
    %85 = tpu.matmul %80, %84, %cst_61 {dimension_numbers = #tpu.dot_dimension_numbers<[1], [0], [0], [1], [0, 0, 1, 1], [], []>} : vector<4x4xf32>, vector<4x512xf32>, vector<4x512xf32> -> vector<4x512xf32>
    %86 = arith.addf %77, %85 : vector<4x512xf32>
    %87 = vector.broadcast %1 : vector<4x1xf32> to vector<4x512xf32>
    %88 = arith.addf %86, %87 : vector<4x512xf32>
    %cst_62 = arith.constant 0.000000e+00 : f32
    %89 = vector.broadcast %cst_62 : f32 to vector<4x512xf32>
    %90 = arith.maximumf %88, %89 : vector<4x512xf32>
    %c0_63 = arith.constant 0 : index
    %c0_64 = arith.constant 0 : index
    %91 = vector.load %arg4[%c0_63, %c0_64] : memref<16x4xbf16, #tpu.memory_space<vmem>>, vector<16x4xbf16>
    %92 = arith.extf %91 : vector<16x4xbf16> to vector<16x4xf32>
    %cst_65 = arith.constant dense<0.000000e+00> : vector<16x512xf32>
    %93 = tpu.matmul %92, %90, %cst_65 {dimension_numbers = #tpu.dot_dimension_numbers<[1], [0], [0], [1], [0, 0, 1, 1], [], []>} : vector<16x4xf32>, vector<4x512xf32>, vector<16x512xf32> -> vector<16x512xf32>
    %94 = vector.broadcast %2 : vector<16x1xf32> to vector<16x512xf32>
    %95 = arith.addf %93, %94 : vector<16x512xf32>
    %c0_66 = arith.constant 0 : index
    %c0_67 = arith.constant 0 : index
    %96 = vector.load %arg1[%c0_66, %c0_67] : memref<16x512xf32, #tpu.memory_space<vmem>>, vector<16x512xf32>
    %97 = arith.addf %95, %96 : vector<16x512xf32>
    %cst_68 = arith.constant 0.000000e+00 : f32
    %98 = vector.broadcast %cst_68 : f32 to vector<16x512xf32>
    %99 = arith.maximumf %97, %98 : vector<16x512xf32>
    %c0_69 = arith.constant 0 : index
    %c0_70 = arith.constant 0 : index
    %100 = vector.load %arg7[%c0_69, %c0_70] : memref<16x512xf32, #tpu.memory_space<vmem>>, vector<16x512xf32>
    tpu.vector_store %arg7[%c0_69, %c0_70], %99 {strides = array<i32>} : memref<16x512xf32, #tpu.memory_space<vmem>>, vector<16x512xf32>,
    return
  }
  func.func @transform_0(%arg0: i32) -> (i32, i32) {
    %c0_i32 = arith.constant 0 : i32
    %c0_i32_0 = arith.constant 0 : i32
    return %c0_i32, %arg0 : i32, i32
  }
  func.func @transform_1(%arg0: i32) -> (i32, i32) {
    %c0_i32 = arith.constant 0 : i32
    %c0_i32_0 = arith.constant 0 : i32
    %c0_i32_1 = arith.constant 0 : i32
    return %c0_i32, %c0_i32_0 : i32, i32
  }
  func.func @transform_2(%arg0: i32) -> (i32, i32, i32) {
    %c0_i32 = arith.constant 0 : i32
    %c0_i32_0 = arith.constant 0 : i32
    %c0_i32_1 = arith.constant 0 : i32
    %c0_i32_2 = arith.constant 0 : i32
    return %c0_i32, %c0_i32_0, %c0_i32_1 : i32, i32, i32
  }
  func.func @transform_3(%arg0: i32) -> (i32, i32) {
    %c0_i32 = arith.constant 0 : i32
    %c0_i32_0 = arith.constant 0 : i32
    %c0_i32_1 = arith.constant 0 : i32
    return %c0_i32, %c0_i32_0 : i32, i32
  }
  func.func @transform_4(%arg0: i32) -> (i32, i32) {
    %c0_i32 = arith.constant 0 : i32
    %c0_i32_0 = arith.constant 0 : i32
    %c0_i32_1 = arith.constant 0 : i32
    return %c0_i32, %c0_i32_0 : i32, i32
  }
  func.func @transform_5(%arg0: i32) -> (i32, i32, i32) {
    %c0_i32 = arith.constant 0 : i32
    %c0_i32_0 = arith.constant 0 : i32
    %c0_i32_1 = arith.constant 0 : i32
    %c0_i32_2 = arith.constant 0 : i32
    return %c0_i32, %c0_i32_0, %c0_i32_1 : i32, i32, i32
  }
  func.func @transform_6(%arg0: i32) -> (i32, i32) {
    %c0_i32 = arith.constant 0 : i32
    %c0_i32_0 = arith.constant 0 : i32
    return %c0_i32, %arg0 : i32, i32
  }
}

</mosaic_0001>

<bundles_post_ra>
// kernel: tpu_custom_call.1
= control target key start
LH: loop header
LB: loop body
LE: loop exit
PB: predicated region body
PF: predicated region fallthrough
CT: control target
= control target key end

     0   :  { %11 = vsyncpa [#allocation3], 0  ;;  %s2701_s0 = inlined_call_operand.hbm [shape: f32[16,512], index: 0, kind: input, shape index: {}]   ;;  %s2702_s1 = inlined_call_operand.vmem [shape: bf16[4,16], index: 1, kind: input, shape index: {}]   ;;  %s2703_s2 = inlined_call_operand.vmem [shape: bf16[9,4,4], index: 2, kind: input, shape index: {}]   ;;  %s2704_s3 = inlined_call_operand.vmem [shape: bf16[16,4], index: 3, kind: input, shape index: {}]   ;;  %s2705_s4 = inlined_call_operand.vmem [shape: f32[24,1], index: 4, kind: input, shape index: {}]   ;;  %s2706_s5 = inlined_call_operand.hbm [shape: f32[8,4,512], index: 5, kind: input, shape index: {}]   ;;  %s2707_s6 = inlined_call_operand.hbm [shape: f32[16,512], index: 6, kind: output, shape index: {}]  }
   0x1   :  { %12 = vsyncpa [#allocation6], 0 }
   0x2   :  { %13 = vsyncpa [#allocation4], 0  ;;  %s2362_s21 = smov [#allocation2]   ;;  %s2290_s25 = scalar_lea.hbm %s2701_s0, 1024 }
   0x3   :  { %s19_s22 = sshll.u32 %s2362_s21, 4  ;;  %p2291_p0 = scmp.ne.s32.totalorder %s2701_s0, %s2290_s25  ;;  %s20_s22 = int_to_ptr.vmem [resolvable:$true] %s19_s22 }
   0x4   :  { %p2294_p1 = scmp.lt.u32.totalorder %s2290_s25, %s2701_s0 }
   0x6   :  { %p2296_p2 = pnand %p2294_p1, %p2291_p0 }
   0x8   :  { %2299 = shalt.err (!%p2296_p2)
}
   0x9   :  { %s2300_s30 = scalar_lea.vmem %s20_s22, 1024  ;;  %p2305_p4 = scmp.lt.s32.totalorder %s20_s22, %s20_s22 }
   0xa   :  { %p2301_p3 = scmp.ne.s32.totalorder %s20_s22, %s2300_s30  ;;  %p2306_p5 = scmp.lt.s32.totalorder %s2300_s30, %s2300_s30 }
   0xc   :  { %p2307_p6 = por %p2306_p5, %p2305_p4 }
   0xe   :  { %p2308_p7 = pnand %p2307_p6, %p2301_p3 }
  0x10   :  { %2311 = shalt.err (!%p2308_p7)
}
  0x11   :  { %s2363_s7 = smov 512   ;;  %s2364_s8 = smov 32  }
  0x12   :  { %25 = dma.hbm_to_vmem [thread:$0]  %s2701_s0, 1024, %s20_s22, [#allocation3], %s2363_s7, %s2363_s7, %s2364_s8  }
  0x13   :  { %s2365_s11 = smov [#allocation5]   ;;  %s2312_s15 = scalar_lea.hbm %s2706_s5, 2048 }
  0x14   :  { %s39_s12 = sshll.u32 %s2365_s11, 4  ;;  %p2313_p8 = scmp.ne.s32.totalorder %s2706_s5, %s2312_s15  ;;  %s40_s12 = int_to_ptr.vmem [resolvable:$true] %s39_s12 }
  0x15   :  { %p2316_p9 = scmp.lt.u32.totalorder %s2312_s15, %s2706_s5 }
  0x17   :  { %p2318_p10 = pnand %p2316_p9, %p2313_p8 }
  0x19   :  { %2321 = shalt.err (!%p2318_p10)
}
  0x1a   :  { %s2322_s20 = scalar_lea.vmem %s40_s12, 2048  ;;  %p2327_p12 = scmp.lt.s32.totalorder %s40_s12, %s40_s12 }
  0x1b   :  { %p2323_p11 = scmp.ne.s32.totalorder %s40_s12, %s2322_s20  ;;  %p2328_p13 = scmp.lt.s32.totalorder %s2322_s20, %s2322_s20 }
  0x1d   :  { %p2329_p0 = por %p2328_p13, %p2327_p12 }
  0x1f   :  { %p2330_p1 = pnand %p2329_p0, %p2323_p11 }
  0x21   :  { %2333 = shalt.err (!%p2330_p1)
}
  0x22   :  { %s2366_s0 = smov 256   ;;  %s2367_s21 = smov 16  }
  0x23   :  { %45 = dma.hbm_to_vmem [thread:$0]  %s2706_s5, 2048, %s40_s12, [#allocation6], %s2366_s0, %s2366_s0, %s2367_s21  }
  0x24   :  { %2356 = dma.done.wait [#allocation3], 1024  }
  0x25   :  { %2357 = vsyncadd [#allocation3], 4294966272 }
  0x26   :  { %2358 = dma.done.wait [#allocation6], 2048  }
  0x27   :  { %2359 = vsyncadd [#allocation6], 4294965248  ;;  %v2368_v0 = vmov 0.0   ;;  %v2369_v1 = vmov 0   ;;  %v2443_v2 = vld [vmem:[#allocation2 + $0x8] sm:$0xff]  ;;  %v2447_v4 = vld [vmem:[#allocation2 + $0x18] sm:$0xff]  ;;  %v231_v33 = vlaneseq }
  0x28   :  { %139 = vmatprep.mubr.f32.mxu0 %v2368_v0  ;;  %210 = vmatprep.mubr.f32.mxu1 %v2368_v0  ;;  %v2445_v3 = vld [vmem:[#allocation2 + $0x28] sm:$0xff]  ;;  %v2451_v6 = vld [vmem:[#allocation2 + $0x38] sm:$0xff]  ;;  %v2453_v7 = vld [vmem:[#allocation2] sm:$0xff]  ;;  %vm71_vm0 = vcmask 130048   ;;  %s2371_s27 = smov 15   ;;  %s2372_s28 = smov 1  }
  0x29   :  { %2272 = vset.pattern.permute.xlu0 %v2369_v1  ;;  %2273 = vset.pattern.permute.xlu1 %v2369_v1  ;;  %v2216_v5 = vpack.c.bf16 %v2445_v3, %v2443_v2  ;;  %v2455_v8 = vld [vmem:[#allocation2 + $0x20] sm:$0xff]  ;;  %v2220_v9 = vpack.c.bf16 %v2451_v6, %v2447_v4  ;;  %v2461_v11 = vld [vmem:[#allocation2 + $0x10] sm:$0xff]  ;;  %s2373_s29 = smov 127   ;;  %s2374_s30 = smov 113   ;;  %v54_v30 = vld [vmem:[%s2705_s4 + $0x8] sm:$0xff]  ;;  %v2528_v34 = vand.u32 127, %v231_v33 }
  0x2a   :  { %v2218_v10 = vpack.c.bf16 %v2455_v8, %v2453_v7  ;;  %v2463_v12 = vld [vmem:[#allocation2 + $0x30] sm:$0xff]  ;;  %v56_v13 = vld [vmem:[%s2702_s1] sm:$0x3]  ;;  %s2370_s1 = smov 17   ;;  %s2375_s9 = smov 112   ;;  %v268_v35 = vld [vmem:[#allocation5 + $0x18] sm:$0xff] }
  0x2b   :  { %2217 = vmatprep.subr.bf16.mxu0 %v2216_v5  ;;  %v2222_v14 = vpack.c.bf16 %v2463_v12, %v2461_v11  ;;  %v57_v15 = vunpack.c.l.bf16 %v56_v13  ;;  %v52_v16 = vld [vmem:[%s2705_s4] sm:$0xf]  ;;  %2221 = vmatprep.subr.bf16.mxu1 %v2220_v9  ;;  %s2376_s10 = smov 111   ;;  %v53_v31 = vld [vmem:[%s2705_s4 + $0x4] sm:$0xf]  ;;  %v55_v32 = vld [vmem:[%s2705_s4 + $0x10] sm:$0xff]  ;;  %v272_v39 = vcombine.high %v268_v35, %v268_v35 }
  0x2c   :  { %2219 = vmatpush1.bf16.msra.mxu0 %v2218_v10  ;;  %68 = vperm.xlu0 %2272, %v52_v16   ;;  %v267_v37 = vld [vmem:[#allocation5 + $0x10] sm:$0xff]  ;;  %vm261_vm1 = vcmp.lt.s32.totalorder %v2528_v34, 16  ;;  %v2142_v40 = vld [vmem:[%s2703_s2 + $0x2] sm:$0x3]  ;;  %vm283_vm2 = vcmask 1043456   ;;  %vm233_vm3 = vcmp.lt.s32.totalorder %v2528_v34, 17 }
  0x2d   :  { %2223 = vmatpush1.bf16.msra.mxu1 %v2222_v14  ;;  %v271_v41 = vcombine.high %v267_v37, %v267_v37  ;;  %v238_v43 = vld [vmem:[#allocation5] sm:$0xff]  ;;  %v252_v47 = vunpack.c.l.bf16 %v2142_v40  ;;  %vm279_vm4 = vcmask 31744   ;;  %v239_v56 = vld [vmem:[#allocation5 + $0x8] sm:$0xff]  ;;  %vm606_vm5 = vcmp.lt.s32.totalorder %v2528_v34, 15 }
  0x2e   :  { %v242_v54 = vcombine.high %v238_v43, %v238_v43  ;;  %v243_v60 = vcombine.high %v239_v56, %v239_v56  ;;  %v612_v62 = vld [vmem:[#allocation5 + $0x20] sm:$0xff]  ;;  %vm796_vm6 = vcmp.lt.s32.totalorder %v2528_v34, 1  ;;  %vm1150_vm7 = vcmp.lt.s32.totalorder %v2528_v34, 127 }
  0x2f   :  { %2140 = vmatmul.mubr.msk.f32.vlgmr.msra.gmra.mrb[0].mxu0 %vm71_vm0, %v57_v15  ;;  %v221_v63 = vld [vmem:[%s2703_s2] sm:$0x3]  ;;  %v616_v16 = vcombine.high %v612_v62, %v612_v62  ;;  %vm1340_vm8 = vcmp.lt.s32.totalorder %v2528_v34, 113  ;;  %vm1530_vm9 = vcmp.lt.s32.totalorder %v2528_v34, 112  ;;  %vm1720_vm10 = vcmp.lt.s32.totalorder %v2528_v34, 111 }
  0x30   :  { %2141 = vmatmul.mubr.msk.f32.vlgmr.msra.gmra.mrb[0].mxu1 %vm71_vm0, %v57_v15  ;;  %360 = vmatprep.mubr.f32.mxu0 %v2368_v0 }
  0x31   :  { %431 = vmatprep.mubr.f32.mxu1 %v2368_v0 }
  0xab   :  { %v69_v17 = vpop.permute.xlu0 %68 }
 0x102   :  { %v141_v18 = vpop.f32.mrb[0].mxu0 }
 0x103   :  { %v212_v19 = vpop.f32.mrb[0].mxu1  ;;  %v142_v20 = vadd.f32 %v141_v18, %v69_v17  ;;  %v143_v21 = vpop.f32.mrb[1].mxu0 }
 0x104   :  { %v213_v22 = vadd.f32 %v212_v19, %v69_v17  ;;  %v214_v23 = vpop.f32.mrb[1].mxu1  ;;  %v144_v27 = vadd.f32 %v143_v21, %v69_v17  ;;  %v613_v19 = vld [vmem:[#allocation5 + $0x28] sm:$0xff] }
 0x105   :  { %v2475_v24 = vmax.f32 %v142_v20, 0.0  ;;  %v215_v25 = vadd.f32 %v214_v23, %v69_v17  ;;  %v222_v17 = vunpack.c.l.bf16 %v221_v63  ;;  %v617_v23 = vcombine.high %v613_v19, %v613_v19 }
 0x106   :  { %v2477_v26 = vmax.f32 %v213_v22, 0.0  ;;  %v2485_v29 = vmax.f32 %v144_v27, 0.0  ;;  %v802_v27 = vld [vmem:[#allocation5 + $0x30] sm:$0xff] }
 0x107   :  { %253 = vrot.lane.b32.xlu0 %v2475_v24, %s2367_s21  ;;  %v2483_v28 = vmax.f32 %v215_v25, 0.0 }
 0x108   :  { %257 = vrot.lane.b32.xlu1 %v2477_v26, %s2367_s21 }
 0x10b   :  { %259 = vrot.lane.b32.xlu0 %v2483_v28, %s2367_s21 }
 0x10c   :  { %255 = vrot.lane.b32.xlu1 %v2485_v29, %s2367_s21 }
 0x10f   :  { %225 = vrot.lane.b32.xlu0 %v2485_v29, %s2370_s1 }
 0x110   :  { %223 = vrot.lane.b32.xlu1 %v2475_v24, %s2370_s1 }
 0x113   :  { %229 = vrot.lane.b32.xlu0 %v2483_v28, %s2370_s1 }
 0x114   :  { %227 = vrot.lane.b32.xlu1 %v2477_v26, %s2370_s1 }
 0x117   :  { %600 = vrot.lane.b32.xlu0 %v2485_v29, %s2371_s27 }
 0x118   :  { %598 = vrot.lane.b32.xlu1 %v2475_v24, %s2371_s27 }
 0x11b   :  { %604 = vrot.lane.b32.xlu0 %v2483_v28, %s2371_s27 }
 0x11c   :  { %602 = vrot.lane.b32.xlu1 %v2477_v26, %s2371_s27 }
 0x11f   :  { %790 = vrot.lane.b32.xlu0 %v2485_v29, %s2372_s28 }
 0x120   :  { %788 = vrot.lane.b32.xlu1 %v2475_v24, %s2372_s28 }
 0x123   :  { %794 = vrot.lane.b32.xlu0 %v2483_v28, %s2372_s28 }
 0x124   :  { %792 = vrot.lane.b32.xlu1 %v2477_v26, %s2372_s28 }
 0x127   :  { %1144 = vrot.lane.b32.xlu0 %v2485_v29, %s2373_s29 }
 0x128   :  { %1142 = vrot.lane.b32.xlu1 %v2475_v24, %s2373_s29 }
 0x12b   :  { %1148 = vrot.lane.b32.xlu0 %v2483_v28, %s2373_s29 }
 0x12c   :  { %1146 = vrot.lane.b32.xlu1 %v2477_v26, %s2373_s29 }
 0x12f   :  { %1334 = vrot.lane.b32.xlu0 %v2485_v29, %s2374_s30 }
 0x130   :  { %1332 = vrot.lane.b32.xlu1 %v2475_v24, %s2374_s30 }
 0x133   :  { %1338 = vrot.lane.b32.xlu0 %v2483_v28, %s2374_s30 }
 0x134   :  { %1336 = vrot.lane.b32.xlu1 %v2477_v26, %s2374_s30 }
 0x137   :  { %1524 = vrot.lane.b32.xlu0 %v2485_v29, %s2375_s9 }
 0x138   :  { %1522 = vrot.lane.b32.xlu1 %v2475_v24, %s2375_s9 }
 0x13b   :  { %1528 = vrot.lane.b32.xlu0 %v2483_v28, %s2375_s9 }
 0x13c   :  { %1526 = vrot.lane.b32.xlu1 %v2477_v26, %s2375_s9 }
 0x13f   :  { %1714 = vrot.lane.b32.xlu0 %v2485_v29, %s2376_s10 }
 0x140   :  { %1712 = vrot.lane.b32.xlu1 %v2475_v24, %s2376_s10 }
 0x143   :  { %1718 = vrot.lane.b32.xlu0 %v2483_v28, %s2376_s10 }
 0x144   :  { %1716 = vrot.lane.b32.xlu1 %v2477_v26, %s2376_s10 }
 0x147   :  { %1918 = vperm.xlu0 %2272, %v54_v30   ;;  %v2155_v30 = vld [vmem:[%s2703_s2 + $0x4] sm:$0x3] }
 0x148   :  { %1901 = vperm.xlu1 %2273, %v53_v31   ;;  %v597_v40 = vunpack.c.l.bf16 %v2155_v30 }
 0x14c   :  { %1923 = vperm.xlu1 %2273, %v55_v32  }
 0x179   :  { %v254_v36 = vpop.permute.xlu0 %253 }
 0x17a   :  { %v258_v38 = vpop.permute.xlu1 %257 }
 0x17d   :  { %v260_v42 = vpop.permute.xlu0 %259 }
 0x17e   :  { %v256_v44 = vpop.permute.xlu1 %255  ;;  %v262_v45 = vsel %vm261_vm1, %v258_v38, %v260_v42  ;;  %v265_v46 = vsel %vm261_vm1, %v260_v42, %v254_v36  ;;  %v803_v42 = vld [vmem:[#allocation5 + $0x38] sm:$0xff] }
 0x17f   :  { %v263_v48 = vsel %vm261_vm1, %v256_v44, %v258_v38  ;;  %v264_v49 = vsel %vm261_vm1, %v254_v36, %v256_v44  ;;  %v275_v50 = vmul.f32 %v267_v37, %v265_v46  ;;  %v278_v51 = vmul.f32 %v272_v39, %v262_v45 }
 0x180   :  { %v276_v52 = vmul.f32 %v271_v41, %v264_v49  ;;  %v277_v53 = vmul.f32 %v268_v35, %v263_v48  ;;  %v806_v39 = vcombine.high %v802_v27, %v802_v27  ;;  %v807_v46 = vcombine.high %v803_v42, %v803_v42  ;;  %v2162_v48 = vld [vmem:[%s2703_s2 + $0x6] sm:$0x3] }
 0x181   :  { %2146 = vmatprep.subr.msk.mxu1 %vm283_vm2, %v278_v51  ;;  %v226_v55 = vpop.permute.xlu0 %225 }
 0x182   :  { %v224_v57 = vpop.permute.xlu1 %223  ;;  %2143 = vmatprep.subr.msk.mxu0 %vm283_vm2, %v276_v52  ;;  %2147 = vmatpush1.msk.msra.mxu1 %vm283_vm2, %v277_v53 }
 0x183   :  { %v236_v58 = vsel %vm233_vm3, %v224_v57, %v226_v55  ;;  %2144 = vmatpush1.msk.msra.mxu0 %vm283_vm2, %v275_v50  ;;  %2148 = vmatmul.mubr.msk.f32.vlgmr.msra.gmra.mrb[2].mxu1 %vm279_vm4, %v252_v47 }
 0x184   :  { %v247_v59 = vmul.f32 %v242_v54, %v236_v58  ;;  %2145 = vmatmul.mubr.msk.f32.vlgmr.msra.gmra.mrb[2].mxu0 %vm279_vm4, %v252_v47  ;;  %588 = vmatprep.mubr.f32.mxu1 %v2368_v0 }
 0x185   :  { %v230_v61 = vpop.permute.xlu0 %229  ;;  %517 = vmatprep.mubr.f32.mxu0 %v2368_v0 }
 0x186   :  { %v228_v1 = vpop.permute.xlu1 %227  ;;  %2149 = vmatprep.subr.msk.mxu0 %vm283_vm2, %v247_v59  ;;  %v237_v5 = vsel %vm233_vm3, %v230_v61, %v224_v57  ;;  %v1157_v57 = vld [vmem:[#allocation5 + $0x48] sm:$0xff] }
 0x187   :  { %v235_v9 = vsel %vm233_vm3, %v226_v55, %v228_v1  ;;  %v234_v10 = vsel %vm233_vm3, %v228_v1, %v230_v61  ;;  %v246_v13 = vmul.f32 %v238_v43, %v237_v5  ;;  %v1161_v61 = vcombine.high %v1157_v57, %v1157_v57 }
 0x188   :  { %v248_v14 = vmul.f32 %v239_v56, %v235_v9  ;;  %v249_v15 = vmul.f32 %v243_v60, %v234_v10  ;;  %v787_v56 = vunpack.c.l.bf16 %v2162_v48  ;;  %v1156_v60 = vld [vmem:[#allocation5 + $0x40] sm:$0xff] }
 0x189   :  { %2150 = vmatpush1.msk.msra.mxu0 %vm283_vm2, %v246_v13  ;;  %v601_v18 = vpop.permute.xlu0 %600 }
 0x18a   :  { %v599_v20 = vpop.permute.xlu1 %598  ;;  %2152 = vmatprep.subr.msk.mxu1 %vm283_vm2, %v249_v15  ;;  %v1347_v15 = vld [vmem:[#allocation5 + $0x58] sm:$0xff] }
 0x18b   :  { %v609_v21 = vsel %vm606_vm5, %v599_v20, %v601_v18  ;;  %2153 = vmatpush1.msk.msra.mxu1 %vm283_vm2, %v248_v14 }
 0x18c   :  { %v621_v22 = vmul.f32 %v616_v16, %v609_v21  ;;  %2151 = vmatmul.mubr.msk.f32.vlgmr.msra.gmra.mrb[2].mxu0 %vm279_vm4, %v222_v17  ;;  %2154 = vmatmul.mubr.msk.f32.vlgmr.msra.gmra.mrb[2].mxu1 %vm279_vm4, %v222_v17 }
 0x18d   :  { %v605_v25 = vpop.permute.xlu0 %604  ;;  %703 = vmatprep.mubr.f32.mxu0 %v2368_v0  ;;  %774 = vmatprep.mubr.f32.mxu1 %v2368_v0 }
 0x18e   :  { %v603_v31 = vpop.permute.xlu1 %602  ;;  %2156 = vmatprep.subr.msk.mxu0 %vm283_vm2, %v621_v22  ;;  %v610_v32 = vsel %vm606_vm5, %v605_v25, %v599_v20  ;;  %v1351_v20 = vcombine.high %v1347_v15, %v1347_v15 }
 0x18f   :  { %v608_v33 = vsel %vm606_vm5, %v601_v18, %v603_v31  ;;  %v607_v35 = vsel %vm606_vm5, %v603_v31, %v605_v25  ;;  %v620_v36 = vmul.f32 %v612_v62, %v610_v32  ;;  %v1160_v62 = vcombine.high %v1156_v60, %v1156_v60 }
 0x190   :  { %v622_v37 = vmul.f32 %v613_v19, %v608_v33  ;;  %v623_v38 = vmul.f32 %v617_v23, %v607_v35  ;;  %v1346_v19 = vld [vmem:[#allocation5 + $0x50] sm:$0xff]  ;;  %v2176_v23 = vld [vmem:[%s2703_s2 + $0xa] sm:$0x3] }
 0x191   :  { %2157 = vmatpush1.msk.msra.mxu0 %vm283_vm2, %v620_v36  ;;  %v791_v41 = vpop.permute.xlu0 %790  ;;  %v1350_v21 = vcombine.high %v1346_v19, %v1346_v19  ;;  %v1141_v36 = vunpack.c.l.bf16 %v2176_v23 }
 0x192   :  { %v789_v43 = vpop.permute.xlu1 %788  ;;  %2159 = vmatprep.subr.msk.mxu1 %vm283_vm2, %v623_v38 }
 0x193   :  { %v799_v44 = vsel %vm796_vm6, %v789_v43, %v791_v41  ;;  %2160 = vmatpush1.msk.msra.mxu1 %vm283_vm2, %v622_v37  ;;  %v1537_v37 = vld [vmem:[#allocation5 + $0x68] sm:$0xff] }
 0x194   :  { %v811_v45 = vmul.f32 %v806_v39, %v799_v44  ;;  %2158 = vmatmul.mubr.msk.f32.vlgmr.msra.gmra.mrb[2].mxu0 %vm279_vm4, %v597_v40  ;;  %2161 = vmatmul.mubr.msk.f32.vlgmr.msra.gmra.mrb[2].mxu1 %vm279_vm4, %v597_v40 }
 0x195   :  { %v795_v47 = vpop.permute.xlu0 %794  ;;  %893 = vmatprep.mubr.f32.mxu0 %v2368_v0  ;;  %964 = vmatprep.mubr.f32.mxu1 %v2368_v0 }
 0x196   :  { %v793_v49 = vpop.permute.xlu1 %792  ;;  %2163 = vmatprep.subr.msk.mxu0 %vm283_vm2, %v811_v45  ;;  %v800_v50 = vsel %vm796_vm6, %v795_v47, %v789_v43  ;;  %v1541_v43 = vcombine.high %v1537_v37, %v1537_v37 }
 0x197   :  { %v798_v51 = vsel %vm796_vm6, %v791_v41, %v793_v49  ;;  %v797_v52 = vsel %vm796_vm6, %v793_v49, %v795_v47  ;;  %v810_v53 = vmul.f32 %v802_v27, %v800_v50 }
 0x198   :  { %v812_v54 = vmul.f32 %v803_v42, %v798_v51  ;;  %v813_v55 = vmul.f32 %v807_v46, %v797_v52  ;;  %v1536_v42 = vld [vmem:[#allocation5 + $0x60] sm:$0xff]  ;;  %v2183_v46 = vld [vmem:[%s2703_s2 + $0xc] sm:$0x3] }
 0x199   :  { %2164 = vmatpush1.msk.msra.mxu0 %vm283_vm2, %v810_v53  ;;  %v1145_v58 = vpop.permute.xlu0 %1144  ;;  %v1540_v44 = vcombine.high %v1536_v42, %v1536_v42 }
 0x19a   :  { %v1143_v59 = vpop.permute.xlu1 %1142  ;;  %2166 = vmatprep.subr.msk.mxu1 %vm283_vm2, %v813_v55  ;;  %2170 = vmatprep.subr.msk.mxu0 %vm283_vm2, %v2485_v29  ;;  %v2169_v29 = vld [vmem:[%s2703_s2 + $0x8] sm:$0x3]  ;;  %v1727_v55 = vld [vmem:[#allocation5 + $0x78] sm:$0xff] }
 0x19b   :  { %2167 = vmatpush1.msk.msra.mxu1 %vm283_vm2, %v812_v54  ;;  %v1331_v54 = vunpack.c.l.bf16 %v2183_v46 }
 0x19c   :  { %2165 = vmatmul.mubr.msk.f32.vlgmr.msra.gmra.mrb[2].mxu0 %vm279_vm4, %v787_v56  ;;  %2168 = vmatmul.mubr.msk.f32.vlgmr.msra.gmra.mrb[2].mxu1 %vm279_vm4, %v787_v56 }
 0x19d   :  { %2171 = vmatpush1.msk.msra.mxu0 %vm283_vm2, %v2475_v24  ;;  %2173 = vmatprep.subr.msk.mxu1 %vm283_vm2, %v2483_v28  ;;  %v1149_v63 = vpop.permute.xlu0 %1148  ;;  %v1153_v24 = vsel %vm1150_vm7, %v1143_v59, %v1145_v58  ;;  %v977_v28 = vunpack.c.l.bf16 %v2169_v29  ;;  %v2190_v29 = vld [vmem:[%s2703_s2 + $0xe] sm:$0x3] }
 0x19e   :  { %2174 = vmatpush1.msk.msra.mxu1 %vm283_vm2, %v2477_v26  ;;  %v1147_v1 = vpop.permute.xlu1 %1146  ;;  %v1154_v5 = vsel %vm1150_vm7, %v1149_v63, %v1143_v59  ;;  %1057 = vmatprep.mubr.f32.mxu0 %v2368_v0  ;;  %v1164_v26 = vmul.f32 %v1156_v60, %v1153_v24  ;;  %v1726_v60 = vld [vmem:[#allocation5 + $0x70] sm:$0xff] }
 0x19f   :  { %v1152_v9 = vsel %vm1150_vm7, %v1145_v58, %v1147_v1  ;;  %v1167_v10 = vmul.f32 %v1161_v61, %v1154_v5  ;;  %1128 = vmatprep.mubr.f32.mxu1 %v2368_v0  ;;  %v1151_v14 = vsel %vm1150_vm7, %v1147_v1, %v1149_v63  ;;  %v1731_v61 = vcombine.high %v1727_v55, %v1727_v55 }
 0x1a0   :  { %v1165_v13 = vmul.f32 %v1160_v62, %v1152_v9  ;;  %v1166_v18 = vmul.f32 %v1157_v57, %v1151_v14  ;;  %v1730_v62 = vcombine.high %v1726_v60, %v1726_v60  ;;  %v1521_v14 = vunpack.c.l.bf16 %v2190_v29 }
 0x1a1   :  { %2180 = vmatprep.subr.msk.mxu1 %vm283_vm2, %v1167_v10  ;;  %v1335_v16 = vpop.permute.xlu0 %1334 }
 0x1a2   :  { %v1333_v17 = vpop.permute.xlu1 %1332  ;;  %2177 = vmatprep.subr.msk.mxu0 %vm283_vm2, %v1165_v13 }
 0x1a3   :  { %v1343_v32 = vsel %vm1340_vm8, %v1333_v17, %v1335_v16 }
 0x1a4   :  { %2172 = vmatmul.mubr.msk.f32.vlgmr.msra.gmra.mrb[2].mxu0 %vm279_vm4, %v977_v28  ;;  %2175 = vmatmul.mubr.msk.f32.vlgmr.msra.gmra.mrb[2].mxu1 %vm279_vm4, %v977_v28  ;;  %v1354_v40 = vmul.f32 %v1346_v19, %v1343_v32 }
 0x1a5   :  { %2178 = vmatpush1.msk.msra.mxu0 %vm283_vm2, %v1164_v26  ;;  %2181 = vmatpush1.msk.msra.mxu1 %vm283_vm2, %v1166_v18  ;;  %v1339_v22 = vpop.permute.xlu0 %1338 }
 0x1a6   :  { %v1337_v25 = vpop.permute.xlu1 %1336  ;;  %v1344_v27 = vsel %vm1340_vm8, %v1339_v22, %v1333_v17  ;;  %1247 = vmatprep.mubr.f32.mxu0 %v2368_v0  ;;  %1318 = vmatprep.mubr.f32.mxu1 %v2368_v0 }
 0x1a7   :  { %v1342_v30 = vsel %vm1340_vm8, %v1335_v16, %v1337_v25  ;;  %v1357_v31 = vmul.f32 %v1351_v20, %v1344_v27  ;;  %v1341_v35 = vsel %vm1340_vm8, %v1337_v25, %v1339_v22  ;;  %v2197_v16 = vld [vmem:[%s2703_s2 + $0x10] sm:$0x3]  ;;  %v2213_v25 = vld [vmem:[%s2704_s3] sm:$0xff]   ;;  %s2377_s3 = smov [#allocation7]  }
 0x1a8   :  { %v1355_v33 = vmul.f32 %v1350_v21, %v1342_v30  ;;  %v1356_v41 = vmul.f32 %v1347_v15, %v1341_v35  ;;  %v1711_v17 = vunpack.c.l.bf16 %v2197_v16  ;;  %s2127_s10 = sshll.u32 %s2377_s3, 4  ;;  %s2128_s10 = int_to_ptr.vmem [resolvable:$true] %s2127_s10 }
 0x1a9   :  { %2187 = vmatprep.subr.msk.mxu1 %vm283_vm2, %v1357_v31  ;;  %v1525_v38 = vpop.permute.xlu0 %1524  ;;  %s2334_s11 = scalar_lea.vmem %s2128_s10, 1024  ;;  %p2339_p3 = scmp.lt.s32.totalorder %s2128_s10, %s2128_s10 }
 0x1aa   :  { %v1523_v39 = vpop.permute.xlu1 %1522  ;;  %2184 = vmatprep.subr.msk.mxu0 %vm283_vm2, %v1355_v33  ;;  %v2214_v33 = vunpack.c.l.bf16 %v2213_v25  ;;  %p2335_p2 = scmp.ne.s32.totalorder %s2128_s10, %s2334_s11  ;;  %p2340_p4 = scmp.lt.s32.totalorder %s2334_s11, %s2334_s11 }
 0x1ab   :  { %v1533_v51 = vsel %vm1530_vm9, %v1523_v39, %v1525_v38 }
 0x1ac   :  { %2179 = vmatmul.mubr.msk.f32.vlgmr.msra.gmra.mrb[2].mxu0 %vm279_vm4, %v1141_v36  ;;  %2182 = vmatmul.mubr.msk.f32.vlgmr.msra.gmra.mrb[2].mxu1 %vm279_vm4, %v1141_v36  ;;  %v1544_v58 = vmul.f32 %v1536_v42, %v1533_v51  ;;  %p2341_p5 = por %p2340_p4, %p2339_p3 }
 0x1ad   :  { %2185 = vmatpush1.msk.msra.mxu0 %vm283_vm2, %v1354_v40  ;;  %2188 = vmatpush1.msk.msra.mxu1 %vm283_vm2, %v1356_v41  ;;  %v1529_v45 = vpop.permute.xlu0 %1528 }
 0x1ae   :  { %v1527_v47 = vpop.permute.xlu1 %1526  ;;  %v1534_v48 = vsel %vm1530_vm9, %v1529_v45, %v1523_v39  ;;  %1437 = vmatprep.mubr.f32.mxu0 %v2368_v0  ;;  %1508 = vmatprep.mubr.f32.mxu1 %v2368_v0  ;;  %p2342_p6 = pnand %p2341_p5, %p2335_p2 }
 0x1af   :  { %v1532_v49 = vsel %vm1530_vm9, %v1525_v38, %v1527_v47  ;;  %v1547_v50 = vmul.f32 %v1541_v43, %v1534_v48  ;;  %v1531_v53 = vsel %vm1530_vm9, %v1527_v47, %v1529_v45 }
 0x1b0   :  { %v1545_v52 = vmul.f32 %v1540_v44, %v1532_v49  ;;  %v1546_v59 = vmul.f32 %v1537_v37, %v1531_v53  ;;  %v2215_v37 = vunpack.c.h.bf16 %v2213_v25 }
 0x1b1   :  { %2194 = vmatprep.subr.msk.mxu1 %vm283_vm2, %v1547_v50  ;;  %v1715_v56 = vpop.permute.xlu0 %1714 }
 0x1b2   :  { %v1713_v57 = vpop.permute.xlu1 %1712  ;;  %2191 = vmatprep.subr.msk.mxu0 %vm283_vm2, %v1545_v52 }
 0x1b3   :  { %v1723_v24 = vsel %vm1720_vm10, %v1713_v57, %v1715_v56 }
 0x1b4   :  { %2186 = vmatmul.mubr.msk.f32.vlgmr.msra.gmra.mrb[2].mxu0 %vm279_vm4, %v1331_v54  ;;  %2189 = vmatmul.mubr.msk.f32.vlgmr.msra.gmra.mrb[2].mxu1 %vm279_vm4, %v1331_v54  ;;  %v1734_v28 = vmul.f32 %v1726_v60, %v1723_v24 }
 0x1b5   :  { %2192 = vmatpush1.msk.msra.mxu0 %vm283_vm2, %v1544_v58  ;;  %2195 = vmatpush1.msk.msra.mxu1 %vm283_vm2, %v1546_v59  ;;  %v1719_v63 = vpop.permute.xlu0 %1718 }
 0x1b6   :  { %v1717_v1 = vpop.permute.xlu1 %1716  ;;  %v1724_v5 = vsel %vm1720_vm10, %v1719_v63, %v1713_v57  ;;  %1627 = vmatprep.mubr.f32.mxu0 %v2368_v0  ;;  %1698 = vmatprep.mubr.f32.mxu1 %v2368_v0 }
 0x1b7   :  { %v1722_v9 = vsel %vm1720_vm10, %v1715_v56, %v1717_v1  ;;  %v1737_v10 = vmul.f32 %v1731_v61, %v1724_v5  ;;  %v1721_v34 = vsel %vm1720_vm10, %v1717_v1, %v1719_v63 }
 0x1b8   :  { %v1735_v13 = vmul.f32 %v1730_v62, %v1722_v9  ;;  %v1736_v15 = vmul.f32 %v1727_v55, %v1721_v34 }
 0x1b9   :  { %2201 = vmatprep.subr.msk.mxu1 %vm283_vm2, %v1737_v10 }
 0x1ba   :  { %2198 = vmatprep.subr.msk.mxu0 %vm283_vm2, %v1735_v13 }
 0x1bc   :  { %2193 = vmatmul.mubr.msk.f32.vlgmr.msra.gmra.mrb[2].mxu0 %vm279_vm4, %v1521_v14  ;;  %2196 = vmatmul.mubr.msk.f32.vlgmr.msra.gmra.mrb[2].mxu1 %vm279_vm4, %v1521_v14 }
 0x1bd   :  { %2199 = vmatpush1.msk.msra.mxu0 %vm283_vm2, %v1734_v28  ;;  %2202 = vmatpush1.msk.msra.mxu1 %vm283_vm2, %v1736_v15 }
 0x1be   :  { %1817 = vmatprep.mubr.f32.mxu0 %v2368_v0  ;;  %1888 = vmatprep.mubr.f32.mxu1 %v2368_v0 }
 0x1c4   :  { %2200 = vmatmul.mubr.msk.f32.vlgmr.msra.gmra.mrb[2].mxu0 %vm279_vm4, %v1711_v17  ;;  %2203 = vmatmul.mubr.msk.f32.vlgmr.msra.gmra.mrb[2].mxu1 %vm279_vm4, %v1711_v17 }
 0x1c5   :  { %2008 = vmatprep.mubr.f32.mxu0 %v2368_v0  ;;  %2085 = vmatprep.mubr.f32.mxu1 %v2368_v0 }
 0x1c6   :  { %v1919_v38 = vpop.permute.xlu0 %1918 }
 0x1c7   :  { %v1902_v26 = vpop.permute.xlu1 %1901 }
 0x1cb   :  { %v1924_v47 = vpop.permute.xlu1 %1923 }
 0x297   :  { %v1819_v18 = vpop.f32.mrb[2].mxu0  ;;  %v1890_v19 = vpop.f32.mrb[2].mxu1 }
 0x298   :  { %v1904_v20 = vadd.f32 %v1902_v26, %v1819_v18  ;;  %v1906_v21 = vadd.f32 %v1902_v26, %v1890_v19  ;;  %v1821_v22 = vpop.f32.mrb[3].mxu0  ;;  %v1892_v23 = vpop.f32.mrb[3].mxu1 }
 0x299   :  { %v1905_v27 = vadd.f32 %v1902_v26, %v1821_v22  ;;  %v1907_v30 = vadd.f32 %v1902_v26, %v1892_v23 }
 0x29a   :  { %v1908_v35 = vmax.f32 %v1904_v20, 0.0  ;;  %v1910_v36 = vmax.f32 %v1906_v21, 0.0 }
 0x29b   :  { %v1909_v31 = vmax.f32 %v1905_v27, 0.0  ;;  %v1911_v32 = vmax.f32 %v1907_v30, 0.0 }
 0x29d   :  { %2204 = vmatprep.subr.msk.mxu0 %vm283_vm2, %v1909_v31  ;;  %2208 = vmatprep.subr.msk.mxu1 %vm283_vm2, %v1911_v32 }
 0x29e   :  { %2205 = vmatpush1.msk.msra.mxu0 %vm283_vm2, %v1908_v35  ;;  %2209 = vmatpush1.msk.msra.mxu1 %vm283_vm2, %v1910_v36 }
 0x29f   :  { %2206 = vmatmul.mubr.msk.f32.vlgmr.msra.gmra.mrb[4].mxu0 %vm279_vm4, %v2214_v33  ;;  %2210 = vmatmul.mubr.msk.f32.vlgmr.msra.gmra.mrb[4].mxu1 %vm279_vm4, %v2214_v33 }
 0x2a0   :  { %2014 = vmatprep.mubr.f32.mxu0 %v2368_v0  ;;  %2091 = vmatprep.mubr.f32.mxu1 %v2368_v0 }
 0x2a3   :  { %2207 = vmatmul.mubr.msk.f32.gmra.mrb[6].mxu0 %vm279_vm4, %v2215_v37  ;;  %2211 = vmatmul.mubr.msk.f32.gmra.mrb[6].mxu1 %vm279_vm4, %v2215_v37 }
 0x372   :  { %v2010_v39 = vpop.f32.mrb[4].mxu0  ;;  %v2087_v40 = vpop.f32.mrb[4].mxu1 }
 0x373   :  { %v2011_v41 = vadd.f32 %v2010_v39, %v1919_v38  ;;  %v2088_v42 = vadd.f32 %v2087_v40, %v1919_v38  ;;  %v2012_v43 = vpop.f32.mrb[5].mxu0  ;;  %v2089_v44 = vpop.f32.mrb[5].mxu1 }
 0x374   :  { %v2013_v45 = vadd.f32 %v2012_v43, %v1919_v38  ;;  %v2090_v46 = vadd.f32 %v2089_v44, %v1919_v38 }
 0x375   :  { %v2098_v48 = vadd.f32 %v2011_v41, %v2453_v7  ;;  %v2100_v49 = vadd.f32 %v2088_v42, %v2461_v11 }
 0x376   :  { %v2099_v0 = vadd.f32 %v2013_v45, %v2443_v2  ;;  %v2101_v50 = vadd.f32 %v2090_v46, %v2447_v4  ;;  %v2016_v51 = vpop.f32.mrb[6].mxu0  ;;  %v2093_v52 = vpop.f32.mrb[6].mxu1 }
 0x377   :  { %v2106_v53 = vmax.f32 %v2098_v48, 0.0  ;;  %v2108_v54 = vmax.f32 %v2100_v49, 0.0  ;;  %v2017_v55 = vadd.f32 %v2016_v51, %v1924_v47  ;;  %v2094_v56 = vadd.f32 %v2093_v52, %v1924_v47  ;;  %v2018_v57 = vpop.f32.mrb[7].mxu0  ;;  %v2095_v58 = vpop.f32.mrb[7].mxu1 }
 0x378   :  { %v2107_v59 = vmax.f32 %v2099_v0, 0.0  ;;  %v2109_v60 = vmax.f32 %v2101_v50, 0.0  ;;  %v2019_v61 = vadd.f32 %v2018_v57, %v1924_v47  ;;  %v2096_v62 = vadd.f32 %v2095_v58, %v1924_v47 }
 0x379   :  { %2114 = vst [vmem:[#allocation7] sm:$0xff] %v2106_v53  ;;  %2116 = vst [vmem:[#allocation7 + $0x10] sm:$0xff] %v2108_v54  ;;  %v2102_v7 = vadd.f32 %v2017_v55, %v2455_v8  ;;  %v2104_v2 = vadd.f32 %v2094_v56, %v2463_v12 }
 0x37a   :  { %2115 = vst [vmem:[#allocation7 + $0x8] sm:$0xff] %v2107_v59  ;;  %2117 = vst [vmem:[#allocation7 + $0x18] sm:$0xff] %v2109_v60  ;;  %v2103_v4 = vadd.f32 %v2019_v61, %v2445_v3  ;;  %v2105_v11 = vadd.f32 %v2096_v62, %v2451_v6 }
 0x37b   :  { %v2110_v63 = vmax.f32 %v2102_v7, 0.0  ;;  %v2112_v29 = vmax.f32 %v2104_v2, 0.0 }
 0x37c   :  { %v2111_v1 = vmax.f32 %v2103_v4, 0.0  ;;  %v2113_v5 = vmax.f32 %v2105_v11, 0.0 }
 0x37d   :  { %2118 = vst [vmem:[#allocation7 + $0x20] sm:$0xff] %v2110_v63  ;;  %2120 = vst [vmem:[#allocation7 + $0x30] sm:$0xff] %v2112_v29 }
 0x37e   :  { %2119 = vst [vmem:[#allocation7 + $0x28] sm:$0xff] %v2111_v1  ;;  %2121 = vst [vmem:[#allocation7 + $0x38] sm:$0xff] %v2113_v5 }
 0x37f   :  { %2345 = shalt.err (!%p2342_p6)
}
 0x380   :  { %s2346_s14 = scalar_lea.hbm %s2707_s6, 1024 }
 0x381   :  { %p2347_p7 = scmp.ne.s32.totalorder %s2707_s6, %s2346_s14  ;;  %p2350_p8 = scmp.lt.u32.totalorder %s2346_s14, %s2707_s6 }
 0x383   :  { %p2352_p9 = pnand %p2350_p8, %p2347_p7 }
 0x385   :  { %2355 = shalt.err (!%p2352_p9)
}
 0x386   :  { %2133 = dma.vmem_to_hbm [thread:$0]  %s2128_s10, 1024, %s2707_s6, [#allocation4], %s2363_s7, %s2363_s7, %s2364_s8  }
 0x387   :  { %2360 = dma.done.wait [#allocation4], 1024  }
 0x388   :  { %2361 = vsyncadd [#allocation4], 4294966272 }
 0x389   :  { %2137 = vsyncpa [#allocation3], 1 }
 0x38a   :  { %2138 = vsyncpa [#allocation6], 1 }
 0x38b   :  { %2139 = vsyncpa [#allocation4], 1 }

</bundles_post_ra>
